<compile_context>
chip_gen: v5e
topology: v5e:2x2
jax: 0.10.0
libtpu: 0.0.40
codegen_flags: <defaults>
</compile_context>

<pallas_src>
import functools

import jax
import jax.numpy as jnp
from jax.experimental import pallas as pl
from jax.experimental.pallas import tpu as pltpu


def _combined_loss_kernel(logits_ref, labels_ref, o_ref, *,
                          hw, tiles_per_part, c_round):
    """Accumulates per-class dice statistics and the CE sum.

    logits_ref: (C, TN) float  -- C classes x TN pixels (one batch element)
    labels_ref: (1, TN) int32  -- class id per pixel
    o_ref:      (1, R, 128) float32 resident accumulator for this partition:
        rows [0, C)                    : sum(probs * onehot)  (intersection)
        rows [c_round, c_round+C)      : sum(probs)
        rows [2*c_round, 2*c_round+C)  : sum(onehot)          (class counts)
        row  3*c_round                 : sum of per-pixel cross-entropy
    """
    p = pl.program_id(0)   # pixel-range partition (parallel across TCs)
    b = pl.program_id(1)   # batch element
    i = pl.program_id(2)   # pixel tile within this partition

    @pl.when((b == 0) & (i == 0))
    def _():
        o_ref[...] = jnp.zeros_like(o_ref)

    x = logits_ref[...].astype(jnp.float32)          # (C, TN)
    lab = labels_ref[...]                            # (1, TN) int32
    C, TN = x.shape

    # mask pixels past the true spatial extent (tail tile / clamped tiles)
    t = p * tiles_per_part + i                       # global pixel-tile index
    lane = jax.lax.broadcasted_iota(jnp.int32, (1, TN), 1)
    valid = (t * TN + lane) < hw                     # (1, TN) bool
    validf = valid.astype(jnp.float32)
    x = jnp.where(valid, x, 0.0)                     # sanitize OOB garbage

    # numerically stable softmax / log-sum-exp over the class (sublane) axis
    m = jnp.max(x, axis=0, keepdims=True)            # (1, TN)
    e = jnp.exp(x - m)                               # (C, TN)
    s = jnp.sum(e, axis=0, keepdims=True)            # (1, TN)
    probs = e / s                                    # (C, TN)
    lse = m + jnp.log(s)                             # (1, TN)

    class_ids = jax.lax.broadcasted_iota(jnp.int32, (C, TN), 0)
    onehot = jnp.where((class_ids == lab) & valid, 1.0, 0.0)     # (C, TN)

    logit_true = jnp.sum(x * onehot, axis=0, keepdims=True)      # (1, TN)
    ce_vec = (lse - logit_true) * validf                         # (1, TN)

    # lane-partial sums (defer the final 128-lane reduce to the wrapper)
    k = TN // 128
    inter_p = jnp.sum((probs * onehot).reshape(C, k, 128), axis=1)   # (C, 128)
    sump_p = jnp.sum((probs * validf).reshape(C, k, 128), axis=1)    # (C, 128)
    cnt_p = jnp.sum(onehot.reshape(C, k, 128), axis=1)               # (C, 128)
    ce_p = jnp.sum(ce_vec.reshape(1, k, 128), axis=1)                # (1, 128)

    # accumulate straight into row slices (each starts on an 8-row boundary)
    o_ref[0, 0:C, :] += inter_p
    o_ref[0, c_round:c_round + C, :] += sump_p
    o_ref[0, 2 * c_round:2 * c_round + C, :] += cnt_p
    o_ref[0, 3 * c_round:3 * c_round + 1, :] += ce_p


@functools.partial(jax.jit, static_argnames=("smooth",))
def combined_loss(logits, labels, *, smooth=1e-6):
    """CrossEntropyLoss(logits, labels) + DiceLoss(logits, labels).

    logits: [B, C, H, W] float (f32 or bf16; passed through unconverted)
    labels: [B, H, W]    int   (values in [0, C))
    """
    B, C, H, W = logits.shape
    hw = H * W
    n_pix = B * hw

    # free reshapes, no transpose: NCHW -> [B, C, H*W], labels -> [B, 1, H*W]
    logits3d = logits.reshape(B, C, hw)
    labels3d = labels.reshape(B, 1, hw).astype(jnp.int32)

    # only pad if the pixel axis is not lane-aligned (rare; keeps blocks legal)
    hw_pad = pl.cdiv(hw, 128) * 128
    if hw_pad != hw:
        logits3d = jnp.pad(logits3d, ((0, 0), (0, 0), (0, hw_pad - hw)))
        labels3d = jnp.pad(labels3d, ((0, 0), (0, 0), (0, hw_pad - hw)))

    # tile size from a conservative double-buffer VMEM budget (fits v5e/v6e/v7x)
    itemsize = jnp.dtype(logits.dtype).itemsize
    budget = 4 * 1024 * 1024
    tile_n = budget // (2 * (C * itemsize + 4))
    tile_n = max(128, min(tile_n, 16384))
    tile_n = (tile_n // 128) * 128
    tile_n = min(tile_n, hw_pad)

    n_tiles = pl.cdiv(hw_pad, tile_n)
    n_parts = 2 if n_tiles >= 2 else 1          # feeds both TCs on v7x
    tiles_per_part = pl.cdiv(n_tiles, n_parts)

    c_round = pl.cdiv(C, 8) * 8                 # 8-row aligned section stride
    rows = 3 * c_round + 8

    def tile_idx(p, i):
        # clamp so partitions that overrun simply re-read (and mask) the last tile
        return jnp.minimum(p * tiles_per_part + i, n_tiles - 1)

    kernel = functools.partial(
        _combined_loss_kernel, hw=hw, tiles_per_part=tiles_per_part,
        c_round=c_round)

    acc = pl.pallas_call(
        kernel,
        out_shape=jax.ShapeDtypeStruct((n_parts, rows, 128), jnp.float32),
        grid_spec=pltpu.PrefetchScalarGridSpec(
            num_scalar_prefetch=0,
            grid=(n_parts, B, tiles_per_part),
            in_specs=[
                pl.BlockSpec((pl.Squeezed(), C, tile_n),
                             lambda p, b, i: (b, 0, tile_idx(p, i))),
                pl.BlockSpec((pl.Squeezed(), 1, tile_n),
                             lambda p, b, i: (b, 0, tile_idx(p, i))),
            ],
            out_specs=pl.BlockSpec((1, rows, 128), lambda p, b, i: (p, 0, 0)),
        ),
        compiler_params=pltpu.CompilerParams(
            dimension_semantics=("parallel", "arbitrary", "arbitrary"),
            vmem_limit_bytes=32 * 1024 * 1024),
    )(logits3d, labels3d)

    acc = jnp.sum(acc, axis=0)                               # (rows, 128)

    intersection = jnp.sum(acc[0:C], axis=1)                 # (C,)
    sum_probs = jnp.sum(acc[c_round:c_round + C], axis=1)    # (C,)
    class_count = jnp.sum(acc[2 * c_round:2 * c_round + C], axis=1)
    ce_sum = jnp.sum(acc[3 * c_round])                       # scalar

    ce_loss = ce_sum / n_pix
    cardinality = sum_probs + class_count
    dice = (2.0 * intersection + smooth) / (cardinality + smooth)
    dice_loss = 1.0 - jnp.mean(dice)
    return ce_loss + dice_loss


def _reference_combined_loss(logits, labels, smooth=1e-6):
    """Pure-JAX reference mirroring the PyTorch module semantics."""
    logits = logits.astype(jnp.float32)
    B, C, H, W = logits.shape
    logp = jax.nn.log_softmax(logits, axis=1)                      # [B,C,H,W]
    onehot = jax.nn.one_hot(labels, C, axis=1, dtype=jnp.float32)  # [B,C,H,W]
    ce = -jnp.mean(jnp.sum(logp * onehot, axis=1))
    probs = jnp.exp(logp)
    dims = (0, 2, 3)
    inter = jnp.sum(probs * onehot, dims)
    card = jnp.sum(probs + onehot, dims)
    dice = (2.0 * inter + smooth) / (card + smooth)
    return ce + (1.0 - jnp.mean(dice))


if __name__ == "__main__":
    key = jax.random.PRNGKey(0)
    k1, k2 = jax.random.split(key)

    B, C, H, W = 2, 4, 16, 16
    logits = jax.random.normal(k1, (B, C, H, W), dtype=jnp.float32)
    labels = jax.random.randint(k2, (B, H, W), 0, C, dtype=jnp.int32)

    out = combined_loss(logits, labels)
    out = jax.block_until_ready(out)

    ref = _reference_combined_loss(logits, labels)
    assert jnp.allclose(out, ref, rtol=1e-5, atol=1e-5), (out, ref)

    print("KERNEL_OK")
</pallas_src>

<mosaic_0001>
module attributes {stable_mosaic.version = 11 : i64} {
  func.func @_combined_loss_kernel(%arg0: i32, %arg1: i32, %arg2: i32, %arg3: memref<1x4x256xf32, #tpu.memory_space<vmem>>, %arg4: memref<1x1x256xi32, #tpu.memory_space<vmem>>, %arg5: memref<1x32x128xf32, #tpu.memory_space<vmem>>) attributes {dimension_semantics = [#tpu.dimension_semantics<parallel>, #tpu.dimension_semantics<arbitrary>, #tpu.dimension_semantics<arbitrary>], iteration_bounds = array<i64: 1, 2, 1>, scalar_prefetch = 0 : i64, scratch_operands = 0 : i64, tpu.core_type = #tpu.core_type<tc>, window_params = [{transform_indices = @transform_0, window_bounds = array<i64: 1, 4, 256>}, {transform_indices = @transform_1, window_bounds = array<i64: 1, 1, 256>}, {transform_indices = @transform_2, window_bounds = array<i64: 1, 32, 128>}]} {
    %c0_i32 = arith.constant 0 : i32
    %0 = arith.cmpi eq, %arg1, %c0_i32 : i32
    %c0_i32_0 = arith.constant 0 : i32
    %1 = arith.cmpi eq, %arg2, %c0_i32_0 : i32
    %2 = arith.andi %0, %1 : i1
    %3 = arith.extui %2 : i1 to i32
    %c0_i32_1 = arith.constant 0 : i32
    %4 = arith.cmpi ne, %3, %c0_i32_1 : i32
    scf.if %4 {
      %cst_38 = arith.constant 0.000000e+00 : f32
      %82 = vector.broadcast %cst_38 : f32 to vector<1x32x128xf32>
      %c0_39 = arith.constant 0 : index
      %c0_40 = arith.constant 0 : index
      %c0_41 = arith.constant 0 : index
      %83 = vector.load %arg5[%c0_39, %c0_40, %c0_41] : memref<1x32x128xf32, #tpu.memory_space<vmem>>, vector<1x32x128xf32>
      tpu.vector_store %arg5[%c0_39, %c0_40, %c0_41], %82 {strides = array<i32>} : memref<1x32x128xf32, #tpu.memory_space<vmem>>, vector<1x32x128xf32>,
    } else {
    }
    %c0 = arith.constant 0 : index
    %c0_2 = arith.constant 0 : index
    %c0_3 = arith.constant 0 : index
    %5 = vector.load %arg3[%c0, %c0_2, %c0_3] : memref<1x4x256xf32, #tpu.memory_space<vmem>>, vector<1x4x256xf32>
    %6 = vector.shape_cast %5 : vector<1x4x256xf32> to vector<4x256xf32>
    %c0_4 = arith.constant 0 : index
    %c0_5 = arith.constant 0 : index
    %c0_6 = arith.constant 0 : index
    %7 = vector.load %arg4[%c0_4, %c0_5, %c0_6] : memref<1x1x256xi32, #tpu.memory_space<vmem>>, vector<1x1x256xi32>
    %8 = vector.shape_cast %7 : vector<1x1x256xi32> to vector<1x256xi32>
    %c1_i32 = arith.constant 1 : i32
    %9 = arith.muli %arg0, %c1_i32 : i32
    %10 = arith.addi %9, %arg2 : i32
    %11 = tpu.iota {dimensions = array<i32: 1>} : vector<1x256xi32>
    %c256_i32 = arith.constant 256 : i32
    %12 = arith.muli %10, %c256_i32 : i32
    %13 = vector.broadcast %12 : i32 to vector<1x256xi32>
    %14 = arith.addi %13, %11 : vector<1x256xi32>
    %c256_i32_7 = arith.constant 256 : i32
    %15 = vector.broadcast %c256_i32_7 : i32 to vector<1x256xi32>
    %16 = arith.cmpi slt, %14, %15 : vector<1x256xi32>
    %17 = arith.extui %16 : vector<1x256xi1> to vector<1x256xi32>
    %18 = arith.sitofp %17 : vector<1x256xi32> to vector<1x256xf32>
    %cst = arith.constant 0.000000e+00 : f32
    %19 = vector.shape_cast %16 : vector<1x256xi1> to vector<1x256xi1>
    %20 = vector.broadcast %19 : vector<1x256xi1> to vector<4x256xi1>
    %21 = vector.broadcast %cst : f32 to vector<4x256xf32>
    %22 = arith.select %20, %6, %21 : vector<4x256xi1>, vector<4x256xf32>
    %cst_8 = arith.constant dense<0xFF800000> : vector<256xf32>
    %23 = vector.multi_reduction <maximumf>, %22, %cst_8 [0] : vector<4x256xf32> to vector<256xf32>
    %24 = vector.shape_cast %23 : vector<256xf32> to vector<1x256xf32>
    %25 = vector.broadcast %24 : vector<1x256xf32> to vector<4x256xf32>
    %26 = arith.subf %22, %25 : vector<4x256xf32>
    %27 = math.exp %26 : vector<4x256xf32>
    %cst_9 = arith.constant dense<0.000000e+00> : vector<256xf32>
    %28 = vector.multi_reduction <add>, %27, %cst_9 [0] : vector<4x256xf32> to vector<256xf32>
    %29 = vector.shape_cast %28 : vector<256xf32> to vector<1x256xf32>
    %30 = vector.broadcast %29 : vector<1x256xf32> to vector<4x256xf32>
    %31 = arith.divf %27, %30 : vector<4x256xf32>
    %32 = math.log %29 : vector<1x256xf32>
    %33 = arith.addf %24, %32 : vector<1x256xf32>
    %34 = tpu.iota {dimensions = array<i32: 0>} : vector<4x256xi32>
    %35 = vector.broadcast %8 : vector<1x256xi32> to vector<4x256xi32>
    %36 = arith.cmpi eq, %34, %35 : vector<4x256xi32>
    %37 = vector.broadcast %16 : vector<1x256xi1> to vector<4x256xi1>
    %38 = arith.andi %36, %37 : vector<4x256xi1>
    %cst_10 = arith.constant 1.000000e+00 : f32
    %cst_11 = arith.constant 0.000000e+00 : f32
    %39 = vector.broadcast %cst_10 : f32 to vector<4x256xf32>
    %40 = vector.broadcast %cst_11 : f32 to vector<4x256xf32>
    %41 = arith.select %38, %39, %40 : vector<4x256xi1>, vector<4x256xf32>
    %42 = arith.mulf %22, %41 : vector<4x256xf32>
    %cst_12 = arith.constant dense<0.000000e+00> : vector<256xf32>
    %43 = vector.multi_reduction <add>, %42, %cst_12 [0] : vector<4x256xf32> to vector<256xf32>
    %44 = vector.shape_cast %43 : vector<256xf32> to vector<1x256xf32>
    %45 = arith.subf %33, %44 : vector<1x256xf32>
    %46 = arith.mulf %45, %18 : vector<1x256xf32>
    %47 = arith.mulf %31, %41 : vector<4x256xf32>
    %48 = vector.shape_cast %47 : vector<4x256xf32> to vector<4x2x128xf32>
    %cst_13 = arith.constant dense<0.000000e+00> : vector<4x128xf32>
    %49 = vector.multi_reduction <add>, %48, %cst_13 [1] : vector<4x2x128xf32> to vector<4x128xf32>
    %50 = vector.broadcast %18 : vector<1x256xf32> to vector<4x256xf32>
    %51 = arith.mulf %31, %50 : vector<4x256xf32>
    %52 = vector.shape_cast %51 : vector<4x256xf32> to vector<4x2x128xf32>
    %cst_14 = arith.constant dense<0.000000e+00> : vector<4x128xf32>
    %53 = vector.multi_reduction <add>, %52, %cst_14 [1] : vector<4x2x128xf32> to vector<4x128xf32>
    %54 = vector.shape_cast %41 : vector<4x256xf32> to vector<4x2x128xf32>
    %cst_15 = arith.constant dense<0.000000e+00> : vector<4x128xf32>
    %55 = vector.multi_reduction <add>, %54, %cst_15 [1] : vector<4x2x128xf32> to vector<4x128xf32>
    %56 = vector.shape_cast %46 : vector<1x256xf32> to vector<1x2x128xf32>
    %cst_16 = arith.constant dense<0.000000e+00> : vector<1x128xf32>
    %57 = vector.multi_reduction <add>, %56, %cst_16 [1] : vector<1x2x128xf32> to vector<1x128xf32>
    %c0_17 = arith.constant 0 : index
    %c0_18 = arith.constant 0 : index
    %c0_19 = arith.constant 0 : index
    %58 = vector.load %arg5[%c0_17, %c0_18, %c0_19] : memref<1x32x128xf32, #tpu.memory_space<vmem>>, vector<1x4x128xf32>
    %59 = vector.shape_cast %58 : vector<1x4x128xf32> to vector<4x128xf32>
    %60 = arith.addf %59, %49 : vector<4x128xf32>
    %c0_20 = arith.constant 0 : index
    %c0_21 = arith.constant 0 : index
    %c0_22 = arith.constant 0 : index
    %61 = vector.load %arg5[%c0_20, %c0_21, %c0_22] : memref<1x32x128xf32, #tpu.memory_space<vmem>>, vector<1x4x128xf32>
    %62 = vector.shape_cast %61 : vector<1x4x128xf32> to vector<4x128xf32>
    %63 = vector.shape_cast %60 : vector<4x128xf32> to vector<1x4x128xf32>
    tpu.vector_store %arg5[%c0_20, %c0_21, %c0_22], %63 {strides = array<i32>} : memref<1x32x128xf32, #tpu.memory_space<vmem>>, vector<1x4x128xf32>,
    %c0_23 = arith.constant 0 : index
    %c8 = arith.constant 8 : index
    %c0_24 = arith.constant 0 : index
    %64 = vector.load %arg5[%c0_23, %c8, %c0_24] : memref<1x32x128xf32, #tpu.memory_space<vmem>>, vector<1x4x128xf32>
    %65 = vector.shape_cast %64 : vector<1x4x128xf32> to vector<4x128xf32>
    %66 = arith.addf %65, %53 : vector<4x128xf32>
    %c0_25 = arith.constant 0 : index
    %c8_26 = arith.constant 8 : index
    %c0_27 = arith.constant 0 : index
    %67 = vector.load %arg5[%c0_25, %c8_26, %c0_27] : memref<1x32x128xf32, #tpu.memory_space<vmem>>, vector<1x4x128xf32>
    %68 = vector.shape_cast %67 : vector<1x4x128xf32> to vector<4x128xf32>
    %69 = vector.shape_cast %66 : vector<4x128xf32> to vector<1x4x128xf32>
    tpu.vector_store %arg5[%c0_25, %c8_26, %c0_27], %69 {strides = array<i32>} : memref<1x32x128xf32, #tpu.memory_space<vmem>>, vector<1x4x128xf32>,
    %c0_28 = arith.constant 0 : index
    %c16 = arith.constant 16 : index
    %c0_29 = arith.constant 0 : index
    %70 = vector.load %arg5[%c0_28, %c16, %c0_29] : memref<1x32x128xf32, #tpu.memory_space<vmem>>, vector<1x4x128xf32>
    %71 = vector.shape_cast %70 : vector<1x4x128xf32> to vector<4x128xf32>
    %72 = arith.addf %71, %55 : vector<4x128xf32>
    %c0_30 = arith.constant 0 : index
    %c16_31 = arith.constant 16 : index
    %c0_32 = arith.constant 0 : index
    %73 = vector.load %arg5[%c0_30, %c16_31, %c0_32] : memref<1x32x128xf32, #tpu.memory_space<vmem>>, vector<1x4x128xf32>
    %74 = vector.shape_cast %73 : vector<1x4x128xf32> to vector<4x128xf32>
    %75 = vector.shape_cast %72 : vector<4x128xf32> to vector<1x4x128xf32>
    tpu.vector_store %arg5[%c0_30, %c16_31, %c0_32], %75 {strides = array<i32>} : memref<1x32x128xf32, #tpu.memory_space<vmem>>, vector<1x4x128xf32>,
    %c0_33 = arith.constant 0 : index
    %c24 = arith.constant 24 : index
    %c0_34 = arith.constant 0 : index
    %76 = vector.load %arg5[%c0_33, %c24, %c0_34] : memref<1x32x128xf32, #tpu.memory_space<vmem>>, vector<1x1x128xf32>
    %77 = vector.shape_cast %76 : vector<1x1x128xf32> to vector<1x128xf32>
    %78 = arith.addf %77, %57 : vector<1x128xf32>
    %c0_35 = arith.constant 0 : index
    %c24_36 = arith.constant 24 : index
    %c0_37 = arith.constant 0 : index
    %79 = vector.load %arg5[%c0_35, %c24_36, %c0_37] : memref<1x32x128xf32, #tpu.memory_space<vmem>>, vector<1x1x128xf32>
    %80 = vector.shape_cast %79 : vector<1x1x128xf32> to vector<1x128xf32>
    %81 = vector.shape_cast %78 : vector<1x128xf32> to vector<1x1x128xf32>
    tpu.vector_store %arg5[%c0_35, %c24_36, %c0_37], %81 {strides = array<i32>} : memref<1x32x128xf32, #tpu.memory_space<vmem>>, vector<1x1x128xf32>,
    return
  }
  func.func @transform_0(%arg0: i32, %arg1: i32, %arg2: i32) -> (i32, i32, i32) {
    %c1_i32 = arith.constant 1 : i32
    %0 = arith.muli %arg0, %c1_i32 : i32
    %1 = arith.addi %0, %arg2 : i32
    %c0_i32 = arith.constant 0 : i32
    %2 = arith.minsi %1, %c0_i32 : i32
    %c0_i32_0 = arith.constant 0 : i32
    %c0_i32_1 = arith.constant 0 : i32
    return %arg1, %c0_i32_0, %2 : i32, i32, i32
  }
  func.func @transform_1(%arg0: i32, %arg1: i32, %arg2: i32) -> (i32, i32, i32) {
    %c1_i32 = arith.constant 1 : i32
    %0 = arith.muli %arg0, %c1_i32 : i32
    %1 = arith.addi %0, %arg2 : i32
    %c0_i32 = arith.constant 0 : i32
    %2 = arith.minsi %1, %c0_i32 : i32
    %c0_i32_0 = arith.constant 0 : i32
    %c0_i32_1 = arith.constant 0 : i32
    return %arg1, %c0_i32_0, %2 : i32, i32, i32
  }
  func.func @transform_2(%arg0: i32, %arg1: i32, %arg2: i32) -> (i32, i32, i32) {
    %c0_i32 = arith.constant 0 : i32
    %c0_i32_0 = arith.constant 0 : i32
    %c0_i32_1 = arith.constant 0 : i32
    return %arg0, %c0_i32, %c0_i32_0 : i32, i32, i32
  }
}

</mosaic_0001>

<bundles_post_ra>
// kernel: combined_loss.1
= control target key start
LH: loop header
LB: loop body
LE: loop exit
PB: predicated region body
PF: predicated region fallthrough
CT: control target
= control target key end

     0   :  { %s786_s9 = smov 0   ;;  %s788_s10 = smov 0   ;;  %s981_s0 = inlined_call_operand.vmem [shape: f32[2,4,256], index: 0, kind: input, shape index: {}]   ;;  %s982_s1 = inlined_call_operand.vmem [shape: s32[2,1,256], index: 1, kind: input, shape index: {}]   ;;  %s983_s2 = inlined_call_operand.vmem [shape: f32[1,32,128], index: 2, kind: output, shape index: {}]  }
   0x1   :  { %s790_s11 = smov 0  }
   0x2 LB: > { %s27_s12 = sadd.s32 1, %s761_s10  ;;  %p693_p0 = scmp.ge.s32.totalorder %s765_s11, 1  ;;  %s765_s11 = sphi %s790_s11, %s12_s11   ;;  %s761_s10 = sphi %s788_s10, %s989_s10   ;;  %s757_s9 = sphi %s786_s9, %s988_s9  }
   0x3   : > { %p29_p1 = scmp.ge.s32.totalorder %s27_s12, 2  ;;  %p178_p2 = scmp.lt.s32.totalorder %s765_s11, 3 }
   0x5   : > { %s991_s12 = smov (%p29_p1, %s27_s12), 0  ;;  %p179_p3 = pnand %p693_p0, %p178_p2 }
   0x6   : > { %p222_p4 = scmp.lt.s32.totalorder (!%p179_p3), %s757_s9, 1  ;;  %p254_p5 = scmp.eq.s32.totalorder (!%p179_p3), %s757_s9, 0 }
   0x7   : > { %182 = sbr.rel (%p179_p3) target bundleno = 118 (0x76), region = 28 }
   0xc   : > { %s993_s9 = smov (!%p222_p4, %s757_s9), 1  ;;  %259 = sbr.rel (!%p254_p5) target bundleno = 17 (0x11), region = 32  ;;  %v767_v0 = vmov (%p254_p5), 0.0  }
   0xd   : > { %s701_s13 = sshll.u32 %s993_s9, 3  ;;  %s696_s14 = sshll.u32 %s993_s9, 1  ;;  %260 = vst [vmem:[%s983_s2] sm:$0xff] (%p254_p5), %v767_v0 }
   0xe   : > { %s229_s17 = scalar_lea.vmem %s981_s0, %s701_s13  ;;  %s244_s20 = scalar_lea.vmem %s982_s1, %s696_s14  ;;  %261 = vst [vmem:[%s983_s2 + $0x8] sm:$0xff] (%p254_p5), %v767_v0 }
   0xf   : > { %262 = vst [vmem:[%s983_s2 + $0x10] sm:$0xff] (%p254_p5), %v767_v0 }
  0x10   : > { %263 = vst [vmem:[%s983_s2 + $0x18] sm:$0xff] (%p254_p5), %v767_v0 }
  0x11 PF: > { %v264_v1 = vld [vmem:[%s229_s17] sm:$0xff]  ;;  %vm290_vm0 = vcmask 1043456   ;;  %v361_v6 = vlaneseq  ;;  %v768_v23 = vmov 0.0   ;;  %v769_v50 = vmov 1983009808  }
  0x12   : > { %283 = vst [vmem:[#allocation1] ss:$2 sm:$0xff] %v264_v1  ;;  %v265_v7 = vld [vmem:[%s244_s20] sm:$0x3]  ;;  %v391_v51 = vunpack.c.l.s4 %v769_v50  ;;  %v770_v62 = vmov 1934713408  }
  0x13   : > { %v362_v12 = vshrl.u32 %v361_v6, 7  ;;  %v363_v13 = vperm.slane %v265_v7, 0  ;;  %v364_v16 = vperm.slane %v265_v7, 1  ;;  %v405_v63 = vunpack.c.l.s4 %v770_v62 }
  0x14   : > { %v846_v58 = vunpack.c.0.s8 %v391_v51  ;;  %vm400_vm3 = vcmask 1047556   ;;  %vm416_vm4 = vcmask 1041408   ;;  %vm571_vm13 = vcmask 1041409  }
  0x15   : > { %vm365_vm1 = vcmp.eq.s32.totalorder %v362_v12, %v363_v13  ;;  %vm366_vm2 = vcmp.eq.s32.totalorder %v362_v12, %v364_v16  ;;  %vm573_vm14 = vcmask 1042434   ;;  %vm575_vm15 = vcmask 1043459  }
  0x16   : > { %v828_v24 = vsel %vm365_vm1, 1.0, %v768_v23  ;;  %v830_v25 = vsel %vm366_vm2, 1.0, %v768_v23 }
  0x17   : > { %v506_v61 = vperm.slane %v830_v25, %v846_v58 }
  0x19   : > { %v284_v2 = vld.sshfl [vmem:[#allocation1] sm:$0xff pattern:$0x75316420]  ;;  %v285_v3 = vld.sshfl [vmem:[#allocation1 + $0x8] sm:$0xff pattern:$0x75316420] }
  0x1a   : > { %v291_v4 = vsel %vm290_vm0, %v284_v2, -inf  ;;  %v298_v5 = vsel %vm290_vm0, %v285_v3, -inf  ;;  %v371_v28 = vmul.f32 %v828_v24, %v284_v2  ;;  %v372_v31 = vmul.f32 %v830_v25, %v285_v3 }
  0x1b   : > { %v292_v8 = vrot.slane %v291_v4, 4  ;;  %v299_v9 = vrot.slane %v298_v5, 4 }
  0x1c   : > { %v373_v32 = vsel %vm290_vm0, %v371_v28, 0.0  ;;  %v380_v33 = vsel %vm290_vm0, %v372_v31, 0.0 }
  0x1d   : > { %v293_v10 = vmax.f32 %v291_v4, %v292_v8  ;;  %v300_v11 = vmax.f32 %v298_v5, %v299_v9  ;;  %v374_v34 = vrot.slane %v373_v32, 4  ;;  %v381_v35 = vrot.slane %v380_v33, 4 }
  0x1e   : > { %v507_v4 = vrot.slane %v506_v61, 4  ;;  %v856_v5 = vunpack.c.0.s8 %v405_v63 }
  0x1f   : > { %v294_v14 = vrot.slane %v293_v10, 2  ;;  %v301_v15 = vrot.slane %v300_v11, 2  ;;  %v375_v41 = vadd.f32 %v374_v34, %v373_v32  ;;  %v382_v43 = vadd.f32 %v381_v35, %v380_v33 }
  0x21   : > { %v295_v17 = vmax.f32 %v293_v10, %v294_v14  ;;  %v302_v18 = vmax.f32 %v300_v11, %v301_v15  ;;  %v376_v47 = vrot.slane %v375_v41, 2  ;;  %v383_v49 = vrot.slane %v382_v43, 2 }
  0x23   : > { %v296_v19 = vrot.slane %v295_v17, 1  ;;  %v303_v20 = vrot.slane %v302_v18, 1  ;;  %v377_v55 = vadd.f32 %v376_v47, %v375_v41  ;;  %v384_v57 = vadd.f32 %v383_v49, %v382_v43 }
  0x25   : > { %v824_v21 = vmax.f32 %v295_v17, %v296_v19  ;;  %v826_v22 = vmax.f32 %v302_v18, %v303_v20  ;;  %v378_v0 = vrot.slane %v377_v55, 1  ;;  %v385_v1 = vrot.slane %v384_v57, 1 }
  0x27   : > { %v305_v26 = vsub.f32 %v284_v2, %v824_v21  ;;  %v306_v27 = vsub.f32 %v285_v3, %v826_v22  ;;  %v502_v2 = vperm.slane %v828_v24, %v846_v58  ;;  %v379_v9 = vadd.f32 %v378_v0, %v377_v55 }
  0x28   : > { %v386_v10 = vadd.f32 %v385_v1, %v384_v57 }
  0x29   : > { %v307_v29 = vmul.f32 1.442695, %v305_v26  ;;  %v309_v30 = vmul.f32 1.442695, %v306_v27  ;;  %v509_v8 = vrot.slane %v502_v2, 4  ;;  %v508_v12 = vsel %vm400_vm3, %v507_v4, %v502_v2 }
  0x2a   : > { %v514_v15 = vperm.slane %v508_v12, %v856_v5 }
  0x2b   : > { %731 = vpow2.f32 %v307_v29  ;;  %v510_v14 = vsel %vm400_vm3, %v506_v61, %v509_v8 }
  0x2c   : > { %733 = vpow2.f32 %v309_v30  ;;  %v518_v19 = vperm.slane %v510_v14, %v856_v5  ;;  %v519_v28 = vrot.slane %v514_v15, 4  ;;  %v523_v33 = vsel %vm416_vm4, %v514_v15, 0.0 }
  0x2e   : > { %v521_v41 = vrot.slane %v518_v19, 4 }
  0x31   : > { %v838_v36 = vpop.eup %731 }
  0x32   : > { %v840_v37 = vpop.eup %733  ;;  %v311_v38 = vsel %vm290_vm0, %v838_v36, 0.0 }
  0x33   : > { %v312_v39 = vrot.slane %v311_v38, 4  ;;  %v318_v40 = vsel %vm290_vm0, %v840_v37, 0.0 }
  0x34   : > { %v319_v42 = vrot.slane %v318_v40, 4 }
  0x35   : > { %v313_v44 = vadd.f32 %v312_v39, %v311_v38 }
  0x36   : > { %v320_v45 = vadd.f32 %v319_v42, %v318_v40  ;;  %v520_v40 = vsel %vm400_vm3, 0.0, %v519_v28 }
  0x37   : > { %v314_v46 = vrot.slane %v313_v44, 2 }
  0x38   : > { %v321_v48 = vrot.slane %v320_v45, 2 }
  0x39   : > { %v315_v52 = vadd.f32 %v314_v46, %v313_v44  ;;  %v524_v44 = vrot.slane %v523_v33, 4 }
  0x3a   : > { %v322_v53 = vadd.f32 %v321_v48, %v320_v45  ;;  %v530_v45 = vsel %vm416_vm4, %v520_v40, 0.0  ;;  %v522_v48 = vsel %vm400_vm3, 0.0, %v521_v41 }
  0x3b   : > { %v316_v54 = vrot.slane %v315_v52, 1  ;;  %v531_v49 = vrot.slane %v530_v45, 4  ;;  %v525_v51 = vadd.f32 %v524_v44, %v523_v33  ;;  %v544_v55 = vsel %vm416_vm4, %v522_v48, 0.0 }
  0x3c   : > { %v323_v56 = vrot.slane %v322_v53, 1 }
  0x3d   : > { %v317_v59 = vadd.f32 %v316_v54, %v315_v52  ;;  %v537_v52 = vsel %vm416_vm4, %v518_v19, 0.0 }
  0x3e   : > { %v848_v60 = vadd.f32 %v323_v56, %v322_v53  ;;  %v538_v54 = vrot.slane %v537_v52, 4 }
  0x3f   : > { %735 = vrcp.f32 %v317_v59  ;;  %v334_v3 = vand.u32 2147483647, %v317_v59  ;;  %v336_v6 = vand.u32 2147483648, %v317_v59  ;;  %vm330_vm5 = vweird.f32 %v317_v59 }
  0x40   : > { %737 = vrcp.f32 %v848_v60  ;;  %v349_v7 = vand.u32 2147483647, %v848_v60  ;;  %v351_v11 = vand.u32 2147483648, %v848_v60  ;;  %vm345_vm7 = vweird.f32 %v848_v60 }
  0x41   : > { %739 = vlog2.f32 %v317_v59  ;;  %vm863_vm6 = vcmp.eq.f32.partialorder %v334_v3, 8.507059e+37  ;;  %v337_v23 = vor.u32 1.1754944e-38, %v336_v6  ;;  %v539_v1 = vadd.f32 %v538_v54, %v537_v52  ;;  %v602_v52 = vld [vmem:[%s983_s2 + $0x18] sm:$0x1] }
  0x42   : > { %741 = vlog2.f32 %v848_v60  ;;  %vm870_vm8 = vcmp.eq.f32.partialorder %v349_v7, 8.507059e+37  ;;  %v352_v32 = vor.u32 1.1754944e-38, %v351_v11  ;;  %v545_v11 = vrot.slane %v544_v55, 4 }
  0x43   : > { %v540_v14 = vrot.slane %v539_v1, 2 }
  0x45   : > { %v736_v13 = vpop.eup %735 }
  0x46   : > { %v738_v16 = vpop.eup %737  ;;  %v326_v17 = vmul.f32 %v736_v13, %v317_v59  ;;  %vm331_vm9 = vweird.f32 %v736_v13  ;;  %v526_v59 = vrot.slane %v525_v51, 2 }
  0x47   : > { %v740_v20 = vpop.eup %739  ;;  %v341_v26 = vmul.f32 %v738_v16, %v848_v60  ;;  %vm346_vm10 = vweird.f32 %v738_v16  ;;  %vm332_vm11 = vmor %vm330_vm5, %vm331_vm9 }
  0x48   : > { %v742_v29 = vpop.eup %741  ;;  %v356_v30 = vmul.f32 0.6931472, %v740_v20  ;;  %v327_v31 = vsub.f32 1.0, %v326_v17  ;;  %vm347_vm12 = vmor %vm345_vm7, %vm346_vm10  ;;  %v527_v3 = vadd.f32 %v526_v59, %v525_v51 }
  0x49   : > { %v358_v34 = vmul.f32 0.6931472, %v742_v29  ;;  %v342_v35 = vsub.f32 1.0, %v341_v26 }
  0x4a   : > { %v359_v38 = vadd.f32 %v356_v30, %v824_v21  ;;  %v328_v39 = vmul.f32 %v736_v13, %v327_v31  ;;  %v912_v30 = vadd.f32 %v540_v14, %v539_v1 }
  0x4b   : > { %v360_v42 = vadd.f32 %v358_v34, %v826_v22  ;;  %v343_v43 = vmul.f32 %v738_v16, %v342_v35  ;;  %v532_v22 = vadd.f32 %v531_v49, %v530_v45 }
  0x4c   : > { %v387_v46 = vsub.f32 %v359_v38, %v379_v9  ;;  %v329_v47 = vadd.f32 %v736_v13, %v328_v39 }
  0x4d   : > { %v388_v50 = vsub.f32 %v360_v42, %v386_v10  ;;  %v344_v21 = vadd.f32 %v738_v16, %v343_v43  ;;  %v533_v0 = vrot.slane %v532_v22, 2  ;;  %v528_v10 = vrot.slane %v527_v3, 1 }
  0x4e   : > { %v333_v53 = vsel %vm332_vm11, %v736_v13, %v329_v47 }
  0x4f   : > { %v553_v56 = vrot.slane %v388_v50, 4  ;;  %v338_v57 = vsel %vm863_vm6, %v337_v23, %v333_v53  ;;  %v348_v61 = vsel %vm347_vm12, %v738_v16, %v344_v21  ;;  %v897_v8 = vadd.f32 %v533_v0, %v532_v22 }
  0x50   : > { %v339_v62 = vmul.f32 %v838_v36, %v338_v57  ;;  %v353_v63 = vsel %vm870_vm8, %v352_v32, %v348_v61  ;;  %v905_v19 = vadd.f32 %v528_v10, %v527_v3 }
  0x51   : > { %v554_v60 = vsel %vm400_vm3, %v553_v56, %v387_v46  ;;  %v354_v2 = vmul.f32 %v840_v37, %v353_v63  ;;  %v535_v20 = vrot.slane %v897_v8, 1 }
  0x52   : > { %v558_v4 = vperm.slane %v554_v60, %v856_v5  ;;  %v449_v6 = vperm.slane %v339_v62, %v846_v58  ;;  %v389_v7 = vmul.f32 %v828_v24, %v339_v62 }
  0x53   : > { %v454_v36 = vperm.slane %v354_v2, %v846_v58  ;;  %v394_v9 = vmul.f32 %v830_v25, %v354_v2 }
  0x54   : > { %v559_v12 = vsel %vm416_vm4, %v558_v4, 0.0  ;;  %v457_v13 = vrot.slane %v449_v6, 4  ;;  %v393_v37 = vperm.slane %v389_v7, %v846_v58 }
  0x55   : > { %v560_v15 = vrot.slane %v559_v12, 4  ;;  %v455_v16 = vrot.slane %v454_v36, 4  ;;  %v398_v17 = vperm.slane %v394_v9, %v846_v58  ;;  %v914_v58 = vadd.f32 %v545_v11, %v544_v55 }
  0x56   : > { %v458_v24 = vsel %vm400_vm3, %v454_v36, %v457_v13  ;;  %v402_v18 = vrot.slane %v393_v37, 4 }
  0x57   : > { %v561_v25 = vadd.f32 %v560_v15, %v559_v12  ;;  %v456_v23 = vsel %vm400_vm3, %v455_v16, %v449_v6  ;;  %v466_v26 = vperm.slane %v458_v24, %v856_v5  ;;  %v399_v27 = vrot.slane %v398_v17, 4 }
  0x58   : > { %v462_v28 = vperm.slane %v456_v23, %v856_v5  ;;  %v403_v29 = vsel %vm400_vm3, %v398_v17, %v402_v18  ;;  %v542_v15 = vrot.slane %v912_v30, 1  ;;  %v536_v18 = vadd.f32 %v535_v20, %v897_v8 }
  0x59   : > { %v562_v31 = vrot.slane %v561_v25, 2  ;;  %v469_v32 = vrot.slane %v466_v26, 4  ;;  %v485_v33 = vsel %vm416_vm4, %v466_v26, 0.0  ;;  %v401_v34 = vsel %vm400_vm3, %v399_v27, %v393_v37 }
  0x5a   : > { %v467_v35 = vrot.slane %v462_v28, 4  ;;  %v471_v38 = vsel %vm416_vm4, %v462_v28, 0.0  ;;  %v486_v39 = vrot.slane %v485_v33, 4  ;;  %v407_v40 = vperm.slane %v401_v34, %v856_v5 }
  0x5b   : > { %v563_v41 = vadd.f32 %v562_v31, %v561_v25  ;;  %v470_v42 = vsel %vm400_vm3, 0.0, %v469_v32  ;;  %v472_v43 = vrot.slane %v471_v38, 4  ;;  %v411_v44 = vperm.slane %v403_v29, %v856_v5 }
  0x5c   : > { %v468_v45 = vsel %vm400_vm3, 0.0, %v467_v35  ;;  %v487_v46 = vadd.f32 %v486_v39, %v485_v33  ;;  %v492_v47 = vsel %vm416_vm4, %v470_v42, 0.0  ;;  %v412_v48 = vrot.slane %v407_v40, 4  ;;  %v580_v42 = vld [vmem:[%s983_s2 + $0x8] sm:$0xf] }
  0x5d   : > { %v564_v49 = vrot.slane %v563_v41, 1  ;;  %v473_v50 = vadd.f32 %v472_v43, %v471_v38  ;;  %v478_v21 = vsel %vm416_vm4, %v468_v45, 0.0  ;;  %v493_v51 = vrot.slane %v492_v47, 4 }
  0x5e   : > { %v479_v53 = vrot.slane %v478_v21, 4  ;;  %v488_v22 = vrot.slane %v487_v46, 2  ;;  %v413_v54 = vsel %vm400_vm3, 0.0, %v412_v48  ;;  %v414_v5 = vrot.slane %v411_v44, 4 }
  0x5f   : > { %v565_v55 = vadd.f32 %v564_v49, %v563_v41  ;;  %v474_v56 = vrot.slane %v473_v50, 2  ;;  %v494_v57 = vadd.f32 %v493_v51, %v492_v47  ;;  %v417_v61 = vsel %vm416_vm4, %v407_v40, 0.0 }
  0x60   : > { %v480_v59 = vadd.f32 %v479_v53, %v478_v21  ;;  %v489_v62 = vadd.f32 %v488_v22, %v487_v46  ;;  %v415_v63 = vsel %vm400_vm3, 0.0, %v414_v5  ;;  %v418_v0 = vrot.slane %v417_v61, 4  ;;  %v591_v53 = vld [vmem:[%s983_s2 + $0x10] sm:$0xf] }
  0x61   : > { %v603_v1 = vadd.f32 %v602_v52, %v565_v55  ;;  %v475_v60 = vadd.f32 %v474_v56, %v473_v50  ;;  %v495_v2 = vrot.slane %v494_v57, 2  ;;  %v424_v3 = vsel %vm416_vm4, %v413_v54, 0.0  ;;  %v566_v56 = vld [vmem:[%s983_s2] sm:$0xf] }
  0x62   : > { %v481_v4 = vrot.slane %v480_v59, 2  ;;  %v490_v6 = vrot.slane %v489_v62, 1  ;;  %v419_v7 = vadd.f32 %v418_v0, %v417_v61  ;;  %v425_v36 = vrot.slane %v424_v3, 4 }
  0x63   : > { %604 = vst [vmem:[%s983_s2 + $0x18] sm:$0x1] %v603_v1  ;;  %v476_v9 = vrot.slane %v475_v60, 1  ;;  %v496_v10 = vadd.f32 %v495_v2, %v494_v57  ;;  %v431_v11 = vsel %vm416_vm4, %v411_v44, 0.0  ;;  %v438_v12 = vsel %vm416_vm4, %v415_v63, 0.0 }
  0x64   : > { %v482_v13 = vadd.f32 %v481_v4, %v480_v59  ;;  %v420_v37 = vrot.slane %v419_v7, 2  ;;  %v426_v14 = vadd.f32 %v425_v36, %v424_v3  ;;  %v491_v16 = vadd.f32 %v490_v6, %v489_v62 }
  0x65   : > { %v432_v17 = vrot.slane %v431_v11, 4  ;;  %v439_v24 = vrot.slane %v438_v12, 4  ;;  %v497_v23 = vrot.slane %v496_v10, 1  ;;  %v477_v28 = vadd.f32 %v476_v9, %v475_v60 }
  0x66   : > { %v483_v25 = vrot.slane %v482_v13, 1  ;;  %v421_v26 = vadd.f32 %v420_v37, %v419_v7  ;;  %v427_v27 = vrot.slane %v426_v14, 2  ;;  %v547_v32 = vrot.slane %v914_v58, 2 }
  0x67   : > { %v433_v29 = vadd.f32 %v432_v17, %v431_v11  ;;  %v440_v31 = vadd.f32 %v439_v24, %v438_v12  ;;  %v543_v38 = vadd.f32 %v542_v15, %v912_v30  ;;  %v596_v8 = vsel %vm571_vm13, %v536_v18, %v905_v19 }
  0x68   : > { %v484_v33 = vadd.f32 %v483_v25, %v482_v13  ;;  %v422_v34 = vrot.slane %v421_v26, 1  ;;  %v428_v35 = vadd.f32 %v427_v27, %v426_v14  ;;  %v548_v41 = vadd.f32 %v547_v32, %v914_v58 }
  0x69   : > { %v434_v39 = vrot.slane %v433_v29, 2  ;;  %v441_v40 = vrot.slane %v440_v31, 2  ;;  %v498_v20 = vadd.f32 %v497_v23, %v496_v10  ;;  %v597_v50 = vsel %vm573_vm14, %v543_v38, %v596_v8 }
  0x6a   : > { %v585_v43 = vsel %vm571_vm13, %v484_v33, %v477_v28  ;;  %v429_v44 = vrot.slane %v428_v35, 1  ;;  %v549_v30 = vrot.slane %v548_v41, 1  ;;  %v423_v49 = vadd.f32 %v422_v34, %v421_v26 }
  0x6b   : > { %v586_v45 = vsel %vm573_vm14, %v491_v16, %v585_v43  ;;  %v435_v46 = vadd.f32 %v434_v39, %v433_v29  ;;  %v442_v47 = vadd.f32 %v441_v40, %v440_v31 }
  0x6c   : > { %v587_v48 = vsel %vm575_vm15, %v498_v20, %v586_v45  ;;  %v430_v58 = vadd.f32 %v429_v44, %v428_v35  ;;  %v550_v52 = vadd.f32 %v549_v30, %v548_v41 }
  0x6d   : > { %v589_v19 = vadd.f32 %v587_v48, %v580_v42  ;;  %v436_v21 = vrot.slane %v435_v46, 1  ;;  %v443_v51 = vrot.slane %v442_v47, 1 }
  0x6e   : > { %v572_v22 = vsel %vm571_vm13, %v430_v58, %v423_v49  ;;  %v598_v5 = vsel %vm575_vm15, %v550_v52, %v597_v50 }
  0x6f   : > { %590 = vst [vmem:[%s983_s2 + $0x8] sm:$0xf] %v589_v19  ;;  %v437_v54 = vadd.f32 %v436_v21, %v435_v46  ;;  %v444_v55 = vadd.f32 %v443_v51, %v442_v47  ;;  %v600_v57 = vadd.f32 %v598_v5, %v591_v53 }
  0x71   : > { %v574_v61 = vsel %vm573_vm14, %v437_v54, %v572_v22  ;;  %601 = vst [vmem:[%s983_s2 + $0x10] sm:$0xf] %v600_v57 }
  0x72   : > { %v576_v59 = vsel %vm575_vm15, %v444_v55, %v574_v61 }
  0x73   : > { %v578_v62 = vadd.f32 %v576_v59, %v566_v56 }
  0x75   : > { %579 = vst [vmem:[%s983_s2] sm:$0xf] %v578_v62 }
  0x76 PF: > { %s12_s11 = sadd.s32 1, %s765_s11   ;;  %s988_s9 = smov %s761_s10 }
  0x77   : > { %p9_p6 = scmp.ge.s32.totalorder %s12_s11, 4   ;;  %s989_s10 = smov %s991_s12 }
  0x79   :  { %11 = sbr.rel (!%p9_p6) target bundleno = 2 (0x2), region = 65 }

</bundles_post_ra>
